<compile_context>
chip_gen: v7x
topology: tpu7x:2x2x1
jax: 0.10.0
libtpu: 0.0.40
codegen_flags: <defaults>
</compile_context>

<pallas_src>
import functools

import jax
import jax.numpy as jnp
from jax.experimental import pallas as pl
from jax.experimental.pallas import tpu as pltpu


def _action_head_kernel(x_ref, w_ref, b_ref, o_ref, *, inv_mt):
    # x_ref: (tile_n, M*T, D), w_ref: (D, H), b_ref: (1, H), o_ref: (tile_n, H)

    # Mean over the fused (M, T) axis: single sublane-axis reduction + scale.
    # Accumulate in f32 during the reduce (avoids materializing an upcast copy
    # of the whole block when the input is sub-32-bit; no-op for f32 input).
    pooled = jnp.sum(x_ref[...], axis=1, dtype=jnp.float32) * inv_mt   # (tile_n, D)

    # Linear: pooled @ W + b  -> (tile_n, H)   (MXU matmul, f32 accumulate)
    y = jnp.dot(pooled, w_ref[...], preferred_element_type=jnp.float32)
    y = y + b_ref[...]

    # F.normalize(dim=-1): v / max(||v||_2, 1e-12)  ==  v * rsqrt(max(||v||^2, 1e-24))
    sq = jnp.sum(y * y, axis=-1, keepdims=True)
    inv_norm = jax.lax.rsqrt(jnp.maximum(sq, 1e-24))
    o_ref[...] = (y * inv_norm).astype(o_ref.dtype)


def _round_up(v, m):
    return ((v + m - 1) // m) * m


def action_head_embed(feat, w, b, *, tile_n=None):
    """feat: (N, M, T, J, C); w: (D, H) with D = J*C; b: (H,)."""
    N, M, T, J, C = feat.shape
    D = J * C
    H = w.shape[1]
    assert w.shape[0] == D

    # Glue (pure reshapes, no data movement):
    # permute(0,1,3,4,2).mean(-1).reshape(N,M,-1).mean(1) == mean over the
    # fused M*T axis of the (N, M*T, J*C) view.
    x = feat.reshape(N, M * T, D)
    b2 = b.reshape(1, H)

    kernel = functools.partial(_action_head_kernel, inv_mt=1.0 / (M * T))
    out_shape = jax.ShapeDtypeStruct((N, H), jnp.float32)

    itemsize = jnp.dtype(x.dtype).itemsize
    row_bytes = M * T * D * itemsize
    const_bytes = D * H * jnp.dtype(w.dtype).itemsize + H * 4

    # ---- Tiny-problem path: whole arrays resident in VMEM, no grid/pipeline
    # machinery.  Byte-budget gated so it never exceeds v7x's 32 MiB default
    # scoped VMEM (64 MiB physical); anything bigger goes to the grid path.
    TINY_BUDGET_BYTES = 8 << 20
    if N < 16 and (N * row_bytes + const_bytes + N * H * 4) <= TINY_BUDGET_BYTES:
        return pl.pallas_call(
            kernel,
            out_shape=out_shape,
            in_specs=[
                pl.BlockSpec(memory_space=pltpu.MemorySpace.VMEM),
                pl.BlockSpec(memory_space=pltpu.MemorySpace.VMEM),
                pl.BlockSpec(memory_space=pltpu.MemorySpace.VMEM),
            ],
            out_specs=pl.BlockSpec(memory_space=pltpu.MemorySpace.VMEM),
        )(x, w, b2)

    # ---- Pipelined path: 1-D grid over N with a cdiv grid (handles any N;
    # the tail block's out-of-range output rows are masked on write and all
    # per-row work is independent, so garbage tail rows cannot contaminate
    # valid rows).
    if tile_n is None:
        # HBM-bound: target ~2 MiB x-tiles per grid step (near HBM roofline),
        # capped at 512 rows and rounded to a multiple of 8 (out_spec sublane
        # constraint).  Double-buffered this is well under the 32 MiB scoped
        # VMEM limit on every generation.
        target_bytes = 2 << 20
        tn = max(8, min(512, (target_bytes // max(row_bytes, 1)) // 8 * 8))
        # v7x: keep >= 2 grid steps (when N allows) so ("parallel",) can shard
        # the grid across both TensorCores; harmless on single-TC v5e/v6e.
        if N >= 16:
            tn = min(tn, _round_up(pl.cdiv(N, 2), 8))
        tn = min(tn, _round_up(N, 8))
        tile_n = max(8, tn)

    grid = (pl.cdiv(N, tile_n),)
    return pl.pallas_call(
        kernel,
        out_shape=out_shape,
        grid=grid,
        in_specs=[
            pl.BlockSpec((tile_n, M * T, D), lambda i: (i, 0, 0)),
            # w / b are grid-invariant: constant block index -> Pallas skips the
            # re-DMA after the first step.
            pl.BlockSpec((D, H), lambda i: (0, 0)),
            pl.BlockSpec((1, H), lambda i: (0, 0)),
        ],
        out_specs=pl.BlockSpec((tile_n, H), lambda i: (i, 0)),
        compiler_params=pltpu.CompilerParams(
            dimension_semantics=("parallel",),
        ),
    )(x, w, b2)


def reference(feat, w, b):
    N, M, T, J, C = feat.shape
    pooled = feat.mean(axis=2)                # (N, M, J, C)  == permute + mean over T
    pooled = pooled.reshape(N, M, J * C)      # (N, M, D)
    pooled = pooled.mean(axis=1)              # (N, D)
    y = pooled @ w + b                        # (N, H)
    norm = jnp.sqrt(jnp.sum(y * y, axis=-1, keepdims=True))
    return y / jnp.maximum(norm, 1e-12)


if __name__ == "__main__":
    # Small shapes consistent with the module: dim_rep=C=32, num_joints=J=4,
    # hidden_dim=H=128.  D = J*C = 128.
    M, T, J, C = 2, 8, 4, 32
    D = J * C
    H = 128

    key = jax.random.PRNGKey(0)
    k_feat, k_w, k_b, k_feat2 = jax.random.split(key, 4)

    # Deterministic synthetic fc1 params (nn.Linear(dim_rep*num_joints, hidden_dim)).
    w = jax.random.normal(k_w, (D, H), dtype=jnp.float32) * 0.02
    b = jax.random.normal(k_b, (H,), dtype=jnp.float32) * 0.01
    # TODO(synk): dropout with p=0.0 is identity; no dropout mask is generated.

    # --- tiny-N path (no grid, whole arrays in VMEM, byte-budget gated) ---
    N_small = 2
    feat_s = jax.random.normal(k_feat, (N_small, M, T, J, C), dtype=jnp.float32)
    out_s = jax.block_until_ready(action_head_embed(feat_s, w, b))
    ref_s = reference(feat_s, w, b)
    assert out_s.shape == (N_small, H)
    assert jnp.allclose(out_s, ref_s, atol=1e-5, rtol=1e-5), "mismatch (tiny-N path)"

    # --- pipelined path: non-divisible N exercises the cdiv grid + masked tail ---
    N_big = 20
    feat_b = jax.random.normal(k_feat2, (N_big, M, T, J, C), dtype=jnp.float32)
    out_b = jax.block_until_ready(action_head_embed(feat_b, w, b))
    ref_b = reference(feat_b, w, b)
    assert out_b.shape == (N_big, H)
    assert jnp.allclose(out_b, ref_b, atol=1e-5, rtol=1e-5), "mismatch (grid path)"

    print("KERNEL_OK")
</pallas_src>

<mosaic_0001>
module attributes {stable_mosaic.version = 11 : i64} {
  func.func @_action_head_kernel(%arg0: memref<2x16x128xf32, #tpu.memory_space<vmem>>, %arg1: memref<128x128xf32, #tpu.memory_space<vmem>>, %arg2: memref<1x128xf32, #tpu.memory_space<vmem>>, %arg3: memref<2x128xf32, #tpu.memory_space<vmem>>) attributes {dimension_semantics = [], scalar_prefetch = 0 : i64, scratch_operands = 0 : i64, tpu.core_type = #tpu.core_type<tc>} {
    %c0 = arith.constant 0 : index
    %c0_0 = arith.constant 0 : index
    %c0_1 = arith.constant 0 : index
    %0 = vector.load %arg0[%c0, %c0_0, %c0_1] : memref<2x16x128xf32, #tpu.memory_space<vmem>>, vector<2x16x128xf32>
    %cst = arith.constant dense<0.000000e+00> : vector<2x128xf32>
    %1 = vector.multi_reduction <add>, %0, %cst [1] : vector<2x16x128xf32> to vector<2x128xf32>
    %cst_2 = arith.constant 6.250000e-02 : f32
    %2 = vector.broadcast %cst_2 : f32 to vector<2x128xf32>
    %3 = arith.mulf %1, %2 : vector<2x128xf32>
    %c0_3 = arith.constant 0 : index
    %c0_4 = arith.constant 0 : index
    %4 = vector.load %arg1[%c0_3, %c0_4] : memref<128x128xf32, #tpu.memory_space<vmem>>, vector<128x128xf32>
    %cst_5 = arith.constant dense<0.000000e+00> : vector<2x128xf32>
    %5 = tpu.matmul %3, %4, %cst_5 {dimension_numbers = #tpu.dot_dimension_numbers<[1], [0], [0], [1], [0, 0, 1, 1], [], []>} : vector<2x128xf32>, vector<128x128xf32>, vector<2x128xf32> -> vector<2x128xf32>
    %c0_6 = arith.constant 0 : index
    %c0_7 = arith.constant 0 : index
    %6 = vector.load %arg2[%c0_6, %c0_7] : memref<1x128xf32, #tpu.memory_space<vmem>>, vector<1x128xf32>
    %7 = vector.broadcast %6 : vector<1x128xf32> to vector<2x128xf32>
    %8 = arith.addf %5, %7 : vector<2x128xf32>
    %9 = arith.mulf %8, %8 : vector<2x128xf32>
    %cst_8 = arith.constant dense<0.000000e+00> : vector<2xf32>
    %10 = vector.multi_reduction <add>, %9, %cst_8 [1] : vector<2x128xf32> to vector<2xf32>
    %11 = vector.shape_cast %10 : vector<2xf32> to vector<2x1xf32>
    %cst_9 = arith.constant 1.000000e-24 : f32
    %12 = vector.broadcast %cst_9 : f32 to vector<2x1xf32>
    %13 = arith.maximumf %11, %12 : vector<2x1xf32>
    %14 = math.rsqrt %13 : vector<2x1xf32>
    %15 = vector.broadcast %14 : vector<2x1xf32> to vector<2x128xf32>
    %16 = arith.mulf %8, %15 : vector<2x128xf32>
    %c0_10 = arith.constant 0 : index
    %c0_11 = arith.constant 0 : index
    %17 = vector.load %arg3[%c0_10, %c0_11] : memref<2x128xf32, #tpu.memory_space<vmem>>, vector<2x128xf32>
    tpu.vector_store %arg3[%c0_10, %c0_11], %16 {strides = array<i32>} : memref<2x128xf32, #tpu.memory_space<vmem>>, vector<2x128xf32>,
    return
  }
}

</mosaic_0001>

<bundles_post_ra>
// kernel: tpu_custom_call.1
= control target key start
LH: loop header
LB: loop body
LE: loop exit
PB: predicated region body
PF: predicated region fallthrough
CT: control target
= control target key end

     0   :  { %8 = vsyncpa [#allocation3], 0  ;;  %s412_s0 = inlined_call_operand.hbm [shape: f32[2,16,128], index: 0, kind: input, shape index: {}]   ;;  %s413_s1 = inlined_call_operand.hbm [shape: f32[128,128], index: 1, kind: input, shape index: {}]   ;;  %s414_s2 = inlined_call_operand.vmem [shape: f32[1,128], index: 2, kind: input, shape index: {}]   ;;  %s415_s3 = inlined_call_operand.hbm [shape: f32[2,128], index: 3, kind: output, shape index: {}]  }
   0x1   :  { %9 = vsyncpa [#allocation6], 0 }
   0x2   :  { %10 = vsyncpa [#allocation4], 0  ;;  %s345_s12 = smov [#allocation2]   ;;  %s273_s16 = scalar_lea.hbm %s412_s0, 512 }
   0x3   :  { %s16_s13 = sshll.u32 %s345_s12, 4  ;;  %p274_p0 = scmp.ne.s32.totalorder %s412_s0, %s273_s16  ;;  %s17_s13 = int_to_ptr.vmem [resolvable:$true] %s16_s13 }
   0x4   :  { %p277_p1 = scmp.lt.u32.totalorder %s273_s16, %s412_s0 }
   0x6   :  { %p279_p2 = pnand %p277_p1, %p274_p0 }
   0x8   :  { %282 = shalt.err (!%p279_p2)
}
   0x9   :  { %s283_s21 = scalar_lea.vmem %s17_s13, 512  ;;  %p288_p4 = scmp.lt.s32.totalorder %s17_s13, %s17_s13 }
   0xa   :  { %p284_p3 = scmp.ne.s32.totalorder %s17_s13, %s283_s21  ;;  %p289_p5 = scmp.lt.s32.totalorder %s283_s21, %s283_s21 }
   0xc   :  { %p290_p6 = por %p289_p5, %p288_p4 }
   0xe   :  { %p291_p7 = pnand %p290_p6, %p284_p3 }
  0x10   :  { %294 = shalt.err (!%p291_p7)
}
  0x11   :  { %s346_s22 = smov 128   ;;  %s347_s23 = smov 8  }
  0x12   :  { %22 = dma.hbm_to_vmem [thread:$0]  %s412_s0, 512, %s17_s13, [#allocation3], %s346_s22, %s346_s22, %s347_s23  }
  0x13   :  { %s348_s26 = smov [#allocation5]   ;;  %s295_s30 = scalar_lea.hbm %s413_s1, 2048 }
  0x14   :  { %s28_s27 = sshll.u32 %s348_s26, 4  ;;  %p296_p8 = scmp.ne.s32.totalorder %s413_s1, %s295_s30  ;;  %s29_s27 = int_to_ptr.vmem [resolvable:$true] %s28_s27 }
  0x15   :  { %p299_p9 = scmp.lt.u32.totalorder %s295_s30, %s413_s1 }
  0x17   :  { %p301_p10 = pnand %p299_p9, %p296_p8 }
  0x19   :  { %304 = shalt.err (!%p301_p10)
}
  0x1a   :  { %s305_s8 = scalar_lea.vmem %s29_s27, 2048  ;;  %p310_p12 = scmp.lt.s32.totalorder %s29_s27, %s29_s27 }
  0x1b   :  { %p306_p11 = scmp.ne.s32.totalorder %s29_s27, %s305_s8  ;;  %p311_p13 = scmp.lt.s32.totalorder %s305_s8, %s305_s8 }
  0x1d   :  { %p312_p0 = por %p311_p13, %p310_p12 }
  0x1f   :  { %p313_p1 = pnand %p312_p0, %p306_p11 }
  0x21   :  { %316 = shalt.err (!%p313_p1)
}
  0x22   :  { %34 = dma.hbm_to_vmem [thread:$0]  %s413_s1, 2048, %s29_s27, [#allocation6], %s346_s22, %s346_s22, %s347_s23  }
  0x23   :  { %339 = dma.done.wait [#allocation3], 512  }
  0x24   :  { %340 = vsyncadd [#allocation3], 4294966784 }
  0x25   :  { %341 = dma.done.wait [#allocation6], 2048  }
  0x26   :  { %342 = vsyncadd [#allocation6], 4294965248  ;;  %v349_v0 = vmov 0.0|0.0   ;;  %vm350_vm0 = vmmov 0   ;;  %v351_v1 = vmov 0.0   ;;  %v63_v2 = vld [vmem:[#allocation5] sm:$0xff] }
  0x27   :  { %239 = vmatprep.subr.bf16.mxu0 %v349_v0  ;;  %236 = vmatprep.mubr.msk.f32.mxu0 %vm350_vm0, %v351_v1  ;;  %v64_v3 = vld [vmem:[#allocation5 + $0x8] sm:$0xff]  ;;  %v65_v4 = vld [vmem:[#allocation5 + $0x10] sm:$0xff]  ;;  %v66_v6 = vld [vmem:[#allocation5 + $0x18] sm:$0xff]  ;;  %vm88_vm1 = vcmask 1041409   ;;  %vm162_vm2 = vcmask 1041408   ;;  %s352_s11 = smov [#allocation7]  }
  0x28   :  { %v240_v5 = vpack.c.bf16 %v64_v3, %v63_v2  ;;  %v243_v7 = vpack.c.bf16 %v66_v6, %v65_v4  ;;  %v67_v8 = vld [vmem:[#allocation5 + $0x20] sm:$0xff]  ;;  %v68_v9 = vld [vmem:[#allocation5 + $0x28] sm:$0xff]  ;;  %v45_v12 = vld [vmem:[#allocation2 + $0x10] sm:$0xff]  ;;  %s176_s12 = sshll.u32 %s352_s11, 4  ;;  %s177_s12 = int_to_ptr.vmem [resolvable:$true] %s176_s12 }
  0x29   :  { %v43_v10 = vld [vmem:[#allocation2] sm:$0xff]  ;;  %v44_v11 = vld [vmem:[#allocation2 + $0x8] sm:$0xff]  ;;  %v46_v13 = vld [vmem:[#allocation2 + $0x18] sm:$0xff]  ;;  %v246_v15 = vpack.c.bf16 %v68_v9, %v67_v8  ;;  %s317_s13 = scalar_lea.vmem %s177_s12, 32  ;;  %p322_p3 = scmp.lt.s32.totalorder %s177_s12, %s177_s12 }
  0x2a   :  { %241 = vmatpush3.bf16.msra.mxu0 %v240_v5  ;;  %v47_v14 = vadd.f32 %v44_v11, %v43_v10  ;;  %v54_v16 = vadd.f32 %v46_v13, %v45_v12  ;;  %v69_v17 = vld [vmem:[#allocation5 + $0x30] sm:$0xff]  ;;  %v70_v18 = vld [vmem:[#allocation5 + $0x38] sm:$0xff]  ;;  %v71_v24 = vld [vmem:[#allocation5 + $0x40] sm:$0xff]  ;;  %p318_p2 = scmp.ne.s32.totalorder %s177_s12, %s317_s13  ;;  %p323_p4 = scmp.lt.s32.totalorder %s317_s13, %s317_s13 }
  0x2b   :  { %242 = vmatprep.subr.bf16.mxu0 %v349_v0  ;;  %v249_v22 = vpack.c.bf16 %v70_v18, %v69_v17  ;;  %v72_v25 = vld [vmem:[#allocation5 + $0x48] sm:$0xff]  ;;  %v73_v31 = vld [vmem:[#allocation5 + $0x50] sm:$0xff]  ;;  %v74_v32 = vld [vmem:[#allocation5 + $0x58] sm:$0xff] }
  0x2c   :  { %v48_v19 = vrot.slane %v47_v14, 4  ;;  %v55_v20 = vrot.slane %v54_v16, 4  ;;  %v252_v28 = vpack.c.bf16 %v72_v25, %v71_v24  ;;  %v255_v33 = vpack.c.bf16 %v74_v32, %v73_v31  ;;  %v75_v36 = vld [vmem:[#allocation5 + $0x60] sm:$0xff]  ;;  %v76_v37 = vld [vmem:[#allocation5 + $0x68] sm:$0xff]  ;;  %v77_v41 = vld [vmem:[#allocation5 + $0x70] sm:$0xff]  ;;  %p324_p5 = por %p323_p4, %p322_p3 }
  0x2d   :  { %v258_v38 = vpack.c.bf16 %v76_v37, %v75_v36  ;;  %v78_v42 = vld [vmem:[#allocation5 + $0x78] sm:$0xff]  ;;  %v186_v47 = vld [vmem:[%s414_s2] ss:$0 sm:$0xff] }
  0x2e   :  { %244 = vmatpush3.bf16.msra.mxu0 %v243_v7  ;;  %v49_v21 = vadd.f32 %v48_v19, %v47_v14  ;;  %v56_v23 = vadd.f32 %v55_v20, %v54_v16  ;;  %v261_v43 = vpack.c.bf16 %v78_v42, %v77_v41  ;;  %p325_p6 = pnand %p324_p5, %p318_p2 }
  0x2f   :  { %245 = vmatprep.subr.bf16.mxu0 %v349_v0 }
  0x30   :  { %v50_v26 = vrot.slane %v49_v21, 2  ;;  %v57_v27 = vrot.slane %v56_v23, 2 }
  0x32   :  { %247 = vmatpush3.bf16.msra.mxu0 %v246_v15  ;;  %v51_v29 = vadd.f32 %v50_v26, %v49_v21  ;;  %v58_v30 = vadd.f32 %v57_v27, %v56_v23 }
  0x33   :  { %248 = vmatprep.subr.bf16.mxu0 %v349_v0 }
  0x34   :  { %v52_v34 = vrot.slane %v51_v29, 1  ;;  %v59_v35 = vrot.slane %v58_v30, 1 }
  0x36   :  { %250 = vmatpush3.bf16.msra.mxu0 %v249_v22  ;;  %v53_v39 = vadd.f32 %v52_v34, %v51_v29  ;;  %v60_v40 = vadd.f32 %v59_v35, %v58_v30 }
  0x37   :  { %251 = vmatprep.subr.bf16.mxu0 %v349_v0 }
  0x38   :  { %v61_v44 = vmul.f32 0.0625, %v53_v39  ;;  %v62_v45 = vmul.f32 0.0625, %v60_v40 }
  0x3a   :  { %253 = vmatpush3.bf16.msra.mxu0 %v252_v28  ;;  %v89_v46 = vsel %vm88_vm1, %v62_v45, %v61_v44 }
  0x3b   :  { %254 = vmatprep.subr.bf16.mxu0 %v349_v0 }
  0x3e   :  { %256 = vmatpush3.bf16.msra.mxu0 %v255_v33 }
  0x3f   :  { %257 = vmatprep.subr.bf16.mxu0 %v349_v0 }
  0x42   :  { %259 = vmatpush3.bf16.msra.mxu0 %v258_v38 }
  0x43   :  { %260 = vmatprep.subr.bf16.mxu0 %v349_v0 }
  0x46   :  { %262 = vmatpush3.bf16.msra.mxu0 %v261_v43 }
  0x49   :  { %237 = vmatmul.mubr.f32.vlgmr.msra.gmra.mrb[0].mxu0 %v89_v46 }
 0x11c   :  { %v157_v48 = vpop.f32.mrb[0].mxu0 }
 0x11d   :  { %v158_v49 = vadd.f32 %v186_v47, %v157_v48  ;;  %v238_v50 = vpop.f32.mrb[1].mxu0 }
 0x11f   :  { %v161_v51 = vmul.f32 %v158_v49, %v158_v49 }
 0x121   :  { %v163_v52 = vsel %vm162_vm2, %v161_v51, 0.0 }
 0x122   :  { %164 = vadd.xlane.f32.xlu0 %v163_v52 }
 0x1af   :  { %v165_v53 = vpop.xlane.xlu0 %164 }
 0x1b0   :  { %v166_v54 = vmax.f32 %v165_v53, 1e-24 }
 0x1b2   :  { %271 = vrsqrt.f32 %v166_v54 }
 0x1bc   :  { %v272_v55 = vpop.eup %271 }
 0x1bd   :  { %v168_v56 = vmul.f32 %v272_v55, %v158_v49 }
 0x1bf   :  { %169 = vst [vmem:[#allocation7] sm:$0x3] %v168_v56 }
 0x1c0   :  { %328 = shalt.err (!%p325_p6)
}
 0x1c1   :  { %s329_s15 = scalar_lea.hbm %s415_s3, 32 }
 0x1c2   :  { %p330_p7 = scmp.ne.s32.totalorder %s415_s3, %s329_s15  ;;  %p333_p8 = scmp.lt.u32.totalorder %s329_s15, %s415_s3 }
 0x1c4   :  { %p335_p9 = pnand %p333_p8, %p330_p7 }
 0x1c6   :  { %338 = shalt.err (!%p335_p9)
}
 0x1c7   :  { %179 = dma.vmem_to_hbm [thread:$0]  %s177_s12, 32, %s415_s3, [#allocation4]  }
 0x1c8   :  { %343 = dma.done.wait [#allocation4], 32  }
 0x1c9   :  { %344 = vsyncadd [#allocation4], 4294967264 }
 0x1ca   :  { %183 = vsyncpa [#allocation3], 1 }
 0x1cb   :  { %184 = vsyncpa [#allocation6], 1 }
 0x1cc   :  { %185 = vsyncpa [#allocation4], 1 }

</bundles_post_ra>
